<compile_context>
chip_gen: v7x
topology: tpu7x:2x2x1
jax: 0.10.0
libtpu: 0.0.40
codegen_flags: <defaults>
</compile_context>

<pallas_src>
import jax
import jax.numpy as jnp
from jax.experimental import pallas as pl
from jax.experimental.pallas import tpu as pltpu

BN_EPS = 1e-5


def _pick_tile(num_features: int) -> int:
    """Largest lane-aligned tile (<= 512) that divides F; fall back to full F."""
    for tn in (512, 256, 128):
        if num_features % tn == 0:
            return tn
    return num_features


def _classifier_kernel(x_ref, w1t_ref, bnp_ref, w2t_ref, b2_ref, out_ref, acc_ref):
    k = pl.program_id(0)

    @pl.when(k == 0)
    def _init():
        acc_ref[...] = jnp.zeros_like(acc_ref)

    # ---- Linear 1, one tile of hidden features: (B, F) @ (F, TN) -> (B, TN), f32 acc
    h = jnp.dot(x_ref[...], w1t_ref[...], preferred_element_type=jnp.float32)

    bnp = bnp_ref[...]                 # (3, TN) f32: rows = [b1, gamma, beta]
    b1 = bnp[0:1, :]
    gamma = bnp[1:2, :]
    beta = bnp[2:3, :]
    h = h + b1

    # ---- BatchNorm1d (training semantics: biased batch stats), affine folded
    mean = jnp.mean(h, axis=0, keepdims=True)                    # (1, TN)
    centered = h - mean
    var = jnp.mean(centered * centered, axis=0, keepdims=True)   # (1, TN)
    scale = gamma * jax.lax.rsqrt(var + BN_EPS)                  # EUP rsqrt, cheap (1, TN)
    h_act = jnp.maximum(centered * scale + beta, 0.0)            # ReLU

    # ---- Linear 2 partial: (B, TN) @ (TN, 2), accumulate across feature tiles
    acc_ref[...] += jnp.dot(h_act.astype(w2t_ref.dtype), w2t_ref[...],
                            preferred_element_type=jnp.float32)

    @pl.when(k == pl.num_programs(0) - 1)
    def _finalize():
        out_ref[...] = (acc_ref[...] + b2_ref[...]).astype(out_ref.dtype)


def simple_classifier_forward(x, params, *, weight_dtype=jnp.bfloat16):
    """x: (B, F) float32.  params: dict of w1,b1,gamma,beta,w2,b2 (PyTorch shapes)."""
    B, F = x.shape
    TN = _pick_tile(F)
    num_tiles = F // TN

    # Pre-transpose weights so the kernel does plain x @ W on the MXU; bf16 for bandwidth.
    x_c = x.astype(weight_dtype)
    w1t = params["w1"].T.astype(weight_dtype)                    # (F, F)
    w2t = params["w2"].T.astype(weight_dtype)                    # (F, 2)
    bnp = jnp.stack([params["b1"], params["gamma"], params["beta"]],
                    axis=0).astype(jnp.float32)                  # (3, F)
    b2 = params["b2"].reshape(1, 2).astype(jnp.float32)

    wsize = jnp.dtype(weight_dtype).itemsize
    # double-buffered streamed operands + resident LHS/output + accumulator, plus slack
    vmem_need = (2 * (F * TN * wsize + 3 * TN * 4 + TN * 2 * wsize + 2 * 4)
                 + 2 * B * F * wsize + 2 * B * 2 * 4 + B * 2 * 4 + (1 << 20))
    vmem_limit = int(min(max(2 * vmem_need, 16 << 20), 64 << 20))

    return pl.pallas_call(
        _classifier_kernel,
        out_shape=jax.ShapeDtypeStruct((B, 2), jnp.float32),
        grid=(num_tiles,),
        in_specs=[
            pl.BlockSpec((B, F), lambda k: (0, 0)),     # x: resident across all tiles
            pl.BlockSpec((F, TN), lambda k: (0, k)),    # W1^T column tile (streamed)
            pl.BlockSpec((3, TN), lambda k: (0, k)),    # packed [b1; gamma; beta] tile
            pl.BlockSpec((TN, 2), lambda k: (k, 0)),    # W2^T row tile
            pl.BlockSpec((1, 2), lambda k: (0, 0)),     # b2
        ],
        out_specs=pl.BlockSpec((B, 2), lambda k: (0, 0)),
        scratch_shapes=[pltpu.VMEM((B, 2), jnp.float32)],
        compiler_params=pltpu.CompilerParams(
            dimension_semantics=("arbitrary",),          # reduction axis (shared accumulator)
            vmem_limit_bytes=vmem_limit,
        ),
    )(x_c, w1t, bnp, w2t, b2)


def init_params(key, num_features):
    """Deterministic, PyTorch-like uniform init for the two Linear layers; BN gamma=1, beta=0."""
    k1, k2, k3, k4 = jax.random.split(key, 4)
    bound = 1.0 / jnp.sqrt(num_features)
    return {
        "w1": jax.random.uniform(k1, (num_features, num_features), jnp.float32, -bound, bound),
        "b1": jax.random.uniform(k2, (num_features,), jnp.float32, -bound, bound),
        "gamma": jnp.ones((num_features,), jnp.float32),
        "beta": jnp.zeros((num_features,), jnp.float32),
        "w2": jax.random.uniform(k3, (2, num_features), jnp.float32, -bound, bound),
        "b2": jax.random.uniform(k4, (2,), jnp.float32, -bound, bound),
    }


def _reference_forward(x, params):
    """Pure-JAX f32 reference mirroring the PyTorch forward (training-mode BN)."""
    h = x @ params["w1"].T + params["b1"]
    mean = h.mean(axis=0, keepdims=True)
    var = ((h - mean) ** 2).mean(axis=0, keepdims=True)
    h = (h - mean) / jnp.sqrt(var + BN_EPS) * params["gamma"] + params["beta"]
    h = jnp.maximum(h, 0.0)
    return h @ params["w2"].T + params["b2"]


if __name__ == "__main__":
    B, F = 8, 32
    key = jax.random.PRNGKey(0)
    kx, kp = jax.random.split(key)
    x = jax.random.normal(kx, (B, F), jnp.float32)
    params = init_params(kp, F)

    ref = _reference_forward(x, params)

    # Exact-semantics check in f32.
    out_f32 = jax.block_until_ready(
        simple_classifier_forward(x, params, weight_dtype=jnp.float32))
    assert out_f32.shape == (B, 2)
    assert jnp.allclose(out_f32, ref, atol=1e-4, rtol=1e-4), "f32 kernel mismatch vs reference"

    # Performance config (bf16 MXU path); looser tolerance for bf16 weight rounding.
    out_bf16 = jax.block_until_ready(
        simple_classifier_forward(x, params, weight_dtype=jnp.bfloat16))
    assert out_bf16.shape == (B, 2)
    assert jnp.allclose(out_bf16, ref, atol=5e-2, rtol=5e-2), "bf16 kernel mismatch vs reference"

    print("KERNEL_OK")
</pallas_src>

<mosaic_0001>
module attributes {stable_mosaic.version = 11 : i64} {
  func.func @_classifier_kernel(%arg0: i32, %arg1: memref<8x32xf32, #tpu.memory_space<vmem>>, %arg2: memref<32x32xf32, #tpu.memory_space<vmem>>, %arg3: memref<3x32xf32, #tpu.memory_space<vmem>>, %arg4: memref<32x2xf32, #tpu.memory_space<vmem>>, %arg5: memref<1x2xf32, #tpu.memory_space<vmem>>, %arg6: memref<8x2xf32, #tpu.memory_space<vmem>>, %arg7: memref<8x2xf32, #tpu.memory_space<vmem>>) attributes {dimension_semantics = [#tpu.dimension_semantics<arbitrary>], iteration_bounds = array<i64: 1>, scalar_prefetch = 0 : i64, scratch_operands = 1 : i64, tpu.core_type = #tpu.core_type<tc>, window_params = [{pipeline_mode = #tpu.pipeline_mode<synchronous>, transform_indices = @transform_0, window_bounds = array<i64: 8, 32>}, {transform_indices = @transform_1, window_bounds = array<i64: 32, 32>}, {transform_indices = @transform_2, window_bounds = array<i64: 3, 32>}, {transform_indices = @transform_3, window_bounds = array<i64: 32, 2>}, {pipeline_mode = #tpu.pipeline_mode<synchronous>, transform_indices = @transform_4, window_bounds = array<i64: 1, 2>}, {pipeline_mode = #tpu.pipeline_mode<synchronous>, transform_indices = @transform_5, window_bounds = array<i64: 8, 2>}]} {
    %c0_i32 = arith.constant 0 : i32
    %0 = arith.cmpi eq, %arg0, %c0_i32 : i32
    %1 = arith.extui %0 : i1 to i32
    %c0_i32_0 = arith.constant 0 : i32
    %2 = arith.cmpi ne, %1, %c0_i32_0 : i32
    scf.if %2 {
      %cst_21 = arith.constant 0.000000e+00 : f32
      %41 = vector.broadcast %cst_21 : f32 to vector<8x2xf32>
      %c0_22 = arith.constant 0 : index
      %c0_23 = arith.constant 0 : index
      %42 = vector.load %arg7[%c0_22, %c0_23] : memref<8x2xf32, #tpu.memory_space<vmem>>, vector<8x2xf32>
      tpu.vector_store %arg7[%c0_22, %c0_23], %41 {strides = array<i32>} : memref<8x2xf32, #tpu.memory_space<vmem>>, vector<8x2xf32>,
    } else {
    }
    %c0 = arith.constant 0 : index
    %c0_1 = arith.constant 0 : index
    %3 = vector.load %arg1[%c0, %c0_1] : memref<8x32xf32, #tpu.memory_space<vmem>>, vector<8x32xf32>
    %c0_2 = arith.constant 0 : index
    %c0_3 = arith.constant 0 : index
    %4 = vector.load %arg2[%c0_2, %c0_3] : memref<32x32xf32, #tpu.memory_space<vmem>>, vector<32x32xf32>
    %cst = arith.constant dense<0.000000e+00> : vector<8x32xf32>
    %5 = tpu.matmul %3, %4, %cst {dimension_numbers = #tpu.dot_dimension_numbers<[1], [0], [0], [1], [0, 0, 1, 1], [], []>} : vector<8x32xf32>, vector<32x32xf32>, vector<8x32xf32> -> vector<8x32xf32>
    %c0_4 = arith.constant 0 : index
    %c0_5 = arith.constant 0 : index
    %6 = vector.load %arg3[%c0_4, %c0_5] : memref<3x32xf32, #tpu.memory_space<vmem>>, vector<3x32xf32>
    %7 = vector.extract_strided_slice %6 {offsets = [0, 0], sizes = [1, 32], strides = [1, 1]} : vector<3x32xf32> to vector<1x32xf32>
    %8 = vector.extract_strided_slice %6 {offsets = [1, 0], sizes = [1, 32], strides = [1, 1]} : vector<3x32xf32> to vector<1x32xf32>
    %9 = vector.extract_strided_slice %6 {offsets = [2, 0], sizes = [1, 32], strides = [1, 1]} : vector<3x32xf32> to vector<1x32xf32>
    %10 = vector.broadcast %7 : vector<1x32xf32> to vector<8x32xf32>
    %11 = arith.addf %5, %10 : vector<8x32xf32>
    %cst_6 = arith.constant dense<0.000000e+00> : vector<32xf32>
    %12 = vector.multi_reduction <add>, %11, %cst_6 [0] : vector<8x32xf32> to vector<32xf32>
    %13 = vector.shape_cast %12 : vector<32xf32> to vector<1x32xf32>
    %cst_7 = arith.constant 8.000000e+00 : f32
    %14 = vector.broadcast %cst_7 : f32 to vector<1x32xf32>
    %15 = arith.divf %13, %14 : vector<1x32xf32>
    %16 = vector.broadcast %15 : vector<1x32xf32> to vector<8x32xf32>
    %17 = arith.subf %11, %16 : vector<8x32xf32>
    %18 = arith.mulf %17, %17 : vector<8x32xf32>
    %cst_8 = arith.constant dense<0.000000e+00> : vector<32xf32>
    %19 = vector.multi_reduction <add>, %18, %cst_8 [0] : vector<8x32xf32> to vector<32xf32>
    %20 = vector.shape_cast %19 : vector<32xf32> to vector<1x32xf32>
    %cst_9 = arith.constant 8.000000e+00 : f32
    %21 = vector.broadcast %cst_9 : f32 to vector<1x32xf32>
    %22 = arith.divf %20, %21 : vector<1x32xf32>
    %cst_10 = arith.constant 9.99999974E-6 : f32
    %23 = vector.broadcast %cst_10 : f32 to vector<1x32xf32>
    %24 = arith.addf %22, %23 : vector<1x32xf32>
    %25 = math.rsqrt %24 : vector<1x32xf32>
    %26 = arith.mulf %8, %25 : vector<1x32xf32>
    %27 = vector.broadcast %26 : vector<1x32xf32> to vector<8x32xf32>
    %28 = arith.mulf %17, %27 : vector<8x32xf32>
    %29 = vector.broadcast %9 : vector<1x32xf32> to vector<8x32xf32>
    %30 = arith.addf %28, %29 : vector<8x32xf32>
    %cst_11 = arith.constant 0.000000e+00 : f32
    %31 = vector.broadcast %cst_11 : f32 to vector<8x32xf32>
    %32 = arith.maximumf %30, %31 : vector<8x32xf32>
    %c0_12 = arith.constant 0 : index
    %c0_13 = arith.constant 0 : index
    %33 = vector.load %arg7[%c0_12, %c0_13] : memref<8x2xf32, #tpu.memory_space<vmem>>, vector<8x2xf32>
    %c0_14 = arith.constant 0 : index
    %c0_15 = arith.constant 0 : index
    %34 = vector.load %arg4[%c0_14, %c0_15] : memref<32x2xf32, #tpu.memory_space<vmem>>, vector<32x2xf32>
    %cst_16 = arith.constant dense<0.000000e+00> : vector<8x2xf32>
    %35 = tpu.matmul %32, %34, %cst_16 {dimension_numbers = #tpu.dot_dimension_numbers<[1], [0], [0], [1], [0, 0, 1, 1], [], []>} : vector<8x32xf32>, vector<32x2xf32>, vector<8x2xf32> -> vector<8x2xf32>
    %36 = arith.addf %33, %35 : vector<8x2xf32>
    %c0_17 = arith.constant 0 : index
    %c0_18 = arith.constant 0 : index
    %37 = vector.load %arg7[%c0_17, %c0_18] : memref<8x2xf32, #tpu.memory_space<vmem>>, vector<8x2xf32>
    tpu.vector_store %arg7[%c0_17, %c0_18], %36 {strides = array<i32>} : memref<8x2xf32, #tpu.memory_space<vmem>>, vector<8x2xf32>,
    %c0_i32_19 = arith.constant 0 : i32
    %38 = arith.cmpi eq, %arg0, %c0_i32_19 : i32
    %39 = arith.extui %38 : i1 to i32
    %c0_i32_20 = arith.constant 0 : i32
    %40 = arith.cmpi ne, %39, %c0_i32_20 : i32
    scf.if %40 {
      %c0_21 = arith.constant 0 : index
      %c0_22 = arith.constant 0 : index
      %41 = vector.load %arg7[%c0_21, %c0_22] : memref<8x2xf32, #tpu.memory_space<vmem>>, vector<8x2xf32>
      %c0_23 = arith.constant 0 : index
      %c0_24 = arith.constant 0 : index
      %42 = vector.load %arg5[%c0_23, %c0_24] : memref<1x2xf32, #tpu.memory_space<vmem>>, vector<1x2xf32>
      %43 = vector.broadcast %42 : vector<1x2xf32> to vector<8x2xf32>
      %44 = arith.addf %41, %43 : vector<8x2xf32>
      %c0_25 = arith.constant 0 : index
      %c0_26 = arith.constant 0 : index
      %45 = vector.load %arg6[%c0_25, %c0_26] : memref<8x2xf32, #tpu.memory_space<vmem>>, vector<8x2xf32>
      tpu.vector_store %arg6[%c0_25, %c0_26], %44 {strides = array<i32>} : memref<8x2xf32, #tpu.memory_space<vmem>>, vector<8x2xf32>,
    } else {
    }
    return
  }
  func.func @transform_0(%arg0: i32) -> (i32, i32) {
    %c0_i32 = arith.constant 0 : i32
    %c0_i32_0 = arith.constant 0 : i32
    %c0_i32_1 = arith.constant 0 : i32
    return %c0_i32, %c0_i32_0 : i32, i32
  }
  func.func @transform_1(%arg0: i32) -> (i32, i32) {
    %c0_i32 = arith.constant 0 : i32
    %c0_i32_0 = arith.constant 0 : i32
    return %c0_i32, %arg0 : i32, i32
  }
  func.func @transform_2(%arg0: i32) -> (i32, i32) {
    %c0_i32 = arith.constant 0 : i32
    %c0_i32_0 = arith.constant 0 : i32
    return %c0_i32, %arg0 : i32, i32
  }
  func.func @transform_3(%arg0: i32) -> (i32, i32) {
    %c0_i32 = arith.constant 0 : i32
    %c0_i32_0 = arith.constant 0 : i32
    return %arg0, %c0_i32 : i32, i32
  }
  func.func @transform_4(%arg0: i32) -> (i32, i32) {
    %c0_i32 = arith.constant 0 : i32
    %c0_i32_0 = arith.constant 0 : i32
    %c0_i32_1 = arith.constant 0 : i32
    return %c0_i32, %c0_i32_0 : i32, i32
  }
  func.func @transform_5(%arg0: i32) -> (i32, i32) {
    %c0_i32 = arith.constant 0 : i32
    %c0_i32_0 = arith.constant 0 : i32
    %c0_i32_1 = arith.constant 0 : i32
    return %c0_i32, %c0_i32_0 : i32, i32
  }
}

</mosaic_0001>

<bundles_post_ra>
// kernel: tpu_custom_call.1
= control target key start
LH: loop header
LB: loop body
LE: loop exit
PB: predicated region body
PF: predicated region fallthrough
CT: control target
= control target key end

     0   :  { %10 = vsyncpa [#allocation4], 0  ;;  %s331_s18 = smov [#allocation3]   ;;  %s417_s0 = inlined_call_operand.hbm [shape: f32[8,32], index: 0, kind: input, shape index: {}]   ;;  %s418_s1 = inlined_call_operand.vmem [shape: f32[32,32], index: 1, kind: input, shape index: {}]   ;;  %s419_s2 = inlined_call_operand.vmem [shape: f32[3,32], index: 2, kind: input, shape index: {}]   ;;  %s420_s3 = inlined_call_operand.vmem [shape: f32[32,2], index: 3, kind: input, shape index: {}]   ;;  %s421_s4 = inlined_call_operand.vmem [shape: f32[1,2], index: 4, kind: input, shape index: {}]   ;;  %s422_s5 = inlined_call_operand.vmem [shape: f32[8,2], index: 5, kind: output, shape index: {}]  }
   0x1   :  { %s17_s19 = sshll.u32 %s331_s18, 4  ;;  %s307_s22 = scalar_lea.hbm %s417_s0, 128  ;;  %s18_s19 = int_to_ptr.vmem [resolvable:$true] %s17_s19 }
   0x2   :  { %p308_p0 = scmp.ne.s32.totalorder %s417_s0, %s307_s22  ;;  %p311_p1 = scmp.lt.u32.totalorder %s307_s22, %s417_s0 }
   0x4   :  { %p313_p2 = pnand %p311_p1, %p308_p0 }
   0x6   :  { %316 = shalt.err (!%p313_p2)
}
   0x7   :  { %s317_s27 = scalar_lea.vmem %s18_s19, 128  ;;  %p322_p4 = scmp.lt.s32.totalorder %s18_s19, %s18_s19 }
   0x8   :  { %p318_p3 = scmp.ne.s32.totalorder %s18_s19, %s317_s27  ;;  %p323_p5 = scmp.lt.s32.totalorder %s317_s27, %s317_s27 }
   0xa   :  { %p324_p6 = por %p323_p5, %p322_p4 }
   0xc   :  { %p325_p7 = pnand %p324_p6, %p318_p3 }
   0xe   :  { %328 = shalt.err (!%p325_p7)
}
   0xf   :  { %20 = dma.hbm_to_vmem [thread:$0]  %s417_s0, 128, %s18_s19, [#allocation4]  }
  0x10   :  { %329 = dma.done.wait [#allocation4], 128  }
  0x11   :  { %330 = vsyncadd [#allocation4], 4294967168  ;;  %vm36_vm0 = vcmask 15360   ;;  %v332_v0 = vmov 0.0|0.0   ;;  %v333_v1 = vmov 0.0   ;;  %vm334_vm1 = vmmov 0  }
  0x12   :  { %289 = vmatprep.subr.bf16.mxu0 %v332_v0  ;;  %37 = vst.msk [vmem:[#allocation2] sm:$0xff] %vm36_vm0, %v333_v1  ;;  %275 = vmatprep.mubr.msk.f32.mxu0 %vm334_vm1, %v333_v1  ;;  %v39_v2 = vld [vmem:[%s418_s1] sm:$0xff]  ;;  %v40_v3 = vld [vmem:[%s418_s1 + $0x8] sm:$0xff]  ;;  %v41_v4 = vld [vmem:[%s418_s1 + $0x10] sm:$0xff]  ;;  %vm48_vm2 = vcmask 261120   ;;  %v44_v15 = vlaneseq }
  0x13   :  { %295 = vmatprep.subr.bf16.mxu1 %v332_v0  ;;  %286 = vmatprep.mubr.msk.f32.mxu1 %vm334_vm1, %v333_v1  ;;  %v290_v5 = vpack.c.bf16 %v40_v3, %v39_v2  ;;  %v42_v6 = vld [vmem:[%s418_s1 + $0x18] sm:$0xff]  ;;  %v38_v8 = vld [vmem:[#allocation3] sm:$0xff]  ;;  %v156_v9 = vld [vmem:[%s420_s3] sm:$0xff] }
  0x14   :  { %v293_v7 = vpack.c.bf16 %v42_v6, %v41_v4  ;;  %v157_v10 = vld [vmem:[%s420_s3 + $0x8] sm:$0xff]  ;;  %v158_v12 = vld [vmem:[%s420_s3 + $0x10] sm:$0xff]  ;;  %v159_v13 = vld [vmem:[%s420_s3 + $0x18] sm:$0xff]  ;;  %v45_v16 = vshrl.u32 %v44_v15, 7 }
  0x15   :  { %291 = vmatpush3.bf16.msra.mxu0 %v290_v5  ;;  %v296_v11 = vpack.c.bf16 %v157_v10, %v156_v9  ;;  %v299_v14 = vpack.c.bf16 %v159_v13, %v158_v12  ;;  %v43_v18 = vld [vmem:[%s419_s2] sm:$0x7] }
  0x16   :  { %292 = vmatprep.subr.bf16.mxu0 %v332_v0  ;;  %v46_v17 = vsub.s32 0, %v45_v16  ;;  %v146_v42 = vsub.s32 1, %v45_v16  ;;  %v151_v43 = vsub.s32 2, %v45_v16  ;;  %v256_v55 = vld [vmem:[%s421_s4] ss:$0 sm:$0xff] }
  0x17   :  { %297 = vmatpush3.bf16.msra.mxu1 %v296_v11 }
  0x18   :  { %298 = vmatprep.subr.bf16.mxu1 %v332_v0  ;;  %v47_v19 = vrot.slane %v43_v18, %v46_v17  ;;  %v152_v47 = vrot.slane %v43_v18, %v151_v43 }
  0x19   :  { %294 = vmatpush3.bf16.msra.mxu0 %v293_v7  ;;  %v155_v51 = vld [vmem:[#allocation2] sm:$0xff] }
  0x1b   :  { %300 = vmatpush3.bf16.msra.mxu1 %v299_v14 }
  0x1c   :  { %276 = vmatmul.mubr.msk.f32.vlgmr.msra.gmra.mrb[0].mxu0 %vm48_vm2, %v38_v8 }
  0xef   :  { %v118_v20 = vpop.f32.mrb[0].mxu0 }
  0xf0   :  { %v119_v21 = vadd.f32 %v118_v20, %v47_v19  ;;  %v277_v22 = vpop.f32.mrb[1].mxu0 }
  0xf2   :  { %v122_v23 = vsel %vm48_vm2, %v119_v21, 0.0 }
  0xf3   :  { %v123_v24 = vrot.slane %v122_v23, 4 }
  0xf5   :  { %v124_v25 = vadd.f32 %v123_v24, %v122_v23 }
  0xf7   :  { %v125_v26 = vrot.slane %v124_v25, 2 }
  0xf9   :  { %v126_v27 = vadd.f32 %v125_v26, %v124_v25 }
  0xfb   :  { %v127_v28 = vrot.slane %v126_v27, 1 }
  0xfd   :  { %v128_v29 = vadd.f32 %v127_v28, %v126_v27 }
  0xff   :  { %v130_v30 = vmul.f32 0.125, %v128_v29 }
 0x101   :  { %v131_v31 = vsub.f32 %v119_v21, %v130_v30 }
 0x103   :  { %v132_v32 = vmul.f32 %v131_v31, %v131_v31 }
 0x105   :  { %v133_v33 = vsel %vm48_vm2, %v132_v32, 0.0 }
 0x106   :  { %v134_v34 = vrot.slane %v133_v33, 4 }
 0x108   :  { %v135_v35 = vadd.f32 %v134_v34, %v133_v33 }
 0x10a   :  { %v136_v36 = vrot.slane %v135_v35, 2 }
 0x10c   :  { %v137_v37 = vadd.f32 %v136_v36, %v135_v35 }
 0x10e   :  { %v138_v38 = vrot.slane %v137_v37, 1 }
 0x110   :  { %v139_v39 = vadd.f32 %v138_v38, %v137_v37 }
 0x112   :  { %v140_v40 = vmul.f32 0.125, %v139_v39 }
 0x114   :  { %v141_v41 = vadd.f32 1e-05, %v140_v40 }
 0x116   :  { %305 = vrsqrt.f32 %v141_v41 }
 0x120   :  { %v306_v44 = vpop.eup %305 }
 0x121   :  { %v143_v45 = vmul.f32 %v306_v44, %v43_v18 }
 0x123   :  { %v147_v46 = vrot.slane %v143_v45, %v146_v42 }
 0x125   :  { %v148_v48 = vmul.f32 %v147_v46, %v131_v31 }
 0x127   :  { %v153_v49 = vadd.f32 %v152_v47, %v148_v48 }
 0x129   :  { %v154_v50 = vmax.f32 %v153_v49, 0.0 }
 0x12b   :  { %287 = vmatmul.mubr.msk.f32.vlgmr.msra.gmra.mrb[0].mxu1 %vm48_vm2, %v154_v50 }
 0x1fe   :  { %v229_v52 = vpop.f32.mrb[0].mxu1 }
 0x1ff   :  { %v233_v53 = vadd.f32 %v229_v52, %v155_v51  ;;  %v288_v54 = vpop.f32.mrb[1].mxu1 }
 0x201   :  { %235 = vst.msk [vmem:[#allocation2] sm:$0xff] %vm36_vm0, %v233_v53 }
 0x208   :  { %v239_v56 = vld [vmem:[#allocation2] sm:$0xff] }
 0x209   :  { %v247_v57 = vadd.f32 %v256_v55, %v239_v56 }
 0x20b   :  { %248 = vst.msk [vmem:[%s422_s5] sm:$0xff] %vm36_vm0, %v247_v57 }
 0x20c   :  { %253 = vsyncpa [#allocation4], 1 }

</bundles_post_ra>
